<compile_context>
chip_gen: v5e
topology: v5e:2x2
jax: 0.10.0
libtpu: 0.0.40
codegen_flags: <defaults>
</compile_context>

<pallas_src>
import functools
import math

import jax
import jax.numpy as jnp
from jax import lax
from jax.experimental import pallas as pl
from jax.experimental.pallas import tpu as pltpu


CLS_POS = 1  # the module consumes bert_output[0][:, 1, :]


# ---------------------------------------------------------------------------
# In-kernel helpers (f32 math)
# ---------------------------------------------------------------------------
def _layernorm(x, gamma, beta, eps=1e-12):
    mu = jnp.mean(x, axis=-1, keepdims=True)
    var = jnp.mean((x - mu) ** 2, axis=-1, keepdims=True)
    return (x - mu) * lax.rsqrt(var + eps) * gamma + beta


# ---------------------------------------------------------------------------
# Fused kernel: one BERT encoder layer (position-1 row only downstream of
# attention) + classifier (linear + softmax).  One batch element per grid step.
# ---------------------------------------------------------------------------
def encoder_cls_kernel(
    x_ref,
    wq_ref, bq_ref, wk_ref, bk_ref, wv_ref, bv_ref, wo_ref, bo_ref,
    g1_ref, be1_ref,
    w1_ref, b1_ref, w2_ref, b2_ref,
    g2_ref, be2_ref,
    wc_ref, bc_ref,
    out_ref,
    *, num_heads, n_classes,
):
    x = x_ref[0]                                   # (S, H) bf16
    hidden = x.shape[-1]
    hd = hidden // num_heads
    scale = 1.0 / math.sqrt(hd)

    # K / V need every sequence position; Q (and everything downstream) is
    # only needed for the CLS_POS token, so it is a single row.
    # TODO(synk): apply attention_mask if it can ever contain padding
    # (the module contract here is an all-ones mask).
    x_cls = x[CLS_POS:CLS_POS + 1, :]              # (1, H) bf16
    k = (jnp.dot(x, wk_ref[...], preferred_element_type=jnp.float32)
         + bk_ref[...]).astype(jnp.bfloat16)       # (S, H)
    v = (jnp.dot(x, wv_ref[...], preferred_element_type=jnp.float32)
         + bv_ref[...]).astype(jnp.bfloat16)       # (S, H)
    q = (jnp.dot(x_cls, wq_ref[...], preferred_element_type=jnp.float32)
         + bq_ref[...]).astype(jnp.bfloat16)       # (1, H)

    # Multi-head attention for the single query row.  concat(head_outs) @ Wo
    # is folded into a per-head accumulation (no lane-dim concatenate), and
    # the score contraction is over the head dim (no kh.T / XLU transpose).
    attn = jnp.zeros((1, hidden), jnp.float32)
    for h in range(num_heads):
        sl = slice(h * hd, (h + 1) * hd)
        scores = lax.dot_general(
            q[:, sl], k[:, sl],
            dimension_numbers=(((1,), (1,)), ((), ())),
            preferred_element_type=jnp.float32) * scale          # (1, S)
        m = jnp.max(scores, axis=-1, keepdims=True)
        p = jnp.exp(scores - m)
        p = p * pl.reciprocal(jnp.sum(p, axis=-1, keepdims=True), approx=True)
        ctx = jnp.dot(p.astype(jnp.bfloat16), v[:, sl],
                      preferred_element_type=jnp.float32)        # (1, hd)
        attn = attn + jnp.dot(ctx.astype(jnp.bfloat16), wo_ref[sl, :],
                              preferred_element_type=jnp.float32)
    attn = attn + bo_ref[...]

    x1 = _layernorm(x_cls.astype(jnp.float32) + attn,
                    g1_ref[...], be1_ref[...])                   # (1, H)

    # FFN on the single row only.
    h_ffn = jnp.dot(x1.astype(jnp.bfloat16), w1_ref[...],
                    preferred_element_type=jnp.float32) + b1_ref[...]
    # NOTE: tanh-approx GELU (HF BERT default 'gelu' is the erf form).
    h_ffn = jax.nn.gelu(h_ffn, approximate=True)
    ffn = jnp.dot(h_ffn.astype(jnp.bfloat16), w2_ref[...],
                  preferred_element_type=jnp.float32) + b2_ref[...]

    x2 = _layernorm(x1 + ffn, g2_ref[...], be2_ref[...])         # (1, H)

    # Fused classifier: linear + softmax on a 128-lane-padded output slab.
    logits = jnp.dot(x2.astype(jnp.bfloat16), wc_ref[...],
                     preferred_element_type=jnp.float32) + bc_ref[...]
    col = lax.broadcasted_iota(jnp.int32, logits.shape, 1)
    logits = jnp.where(col < n_classes, logits, jnp.float32(-1e30))
    m = jnp.max(logits, axis=-1, keepdims=True)
    p = jnp.exp(logits - m)
    out_ref[0] = p / jnp.sum(p, axis=-1, keepdims=True)          # (1, Cpad)


# ---------------------------------------------------------------------------
# Wrapper
# ---------------------------------------------------------------------------
def bert_to_goal_forward(src, params, *, num_heads):
    input_ids = src["input_ids"]                 # (B, S) int32
    B, S = input_ids.shape
    H = params["tok_emb"].shape[-1]
    C = params["wc"].shape[-1]
    c_pad = max(128, ((C + 127) // 128) * 128)   # lane-dense output width

    # Glue: embedding lookup (gather) + position embeddings; carried in bf16.
    x = (params["tok_emb"][input_ids]
         + params["pos_emb"][None, :, :]).astype(jnp.bfloat16)   # (B, S, H)

    bf = lambda n: params[n].astype(jnp.bfloat16)   # matmul weights
    f32 = lambda n: params[n].astype(jnp.float32)   # biases / LN params

    # Lane-pad the classifier weight/bias to c_pad; padded lanes are masked
    # to -inf inside the kernel before the softmax.
    wc_pad = jnp.zeros((H, c_pad), jnp.bfloat16).at[:, :C].set(bf("wc"))
    bc_pad = jnp.zeros((1, c_pad), jnp.float32).at[:, :C].set(f32("bc"))

    weights = [
        bf("wq"), f32("bq"), bf("wk"), f32("bk"), bf("wv"), f32("bv"),
        bf("wo"), f32("bo"),
        f32("g1"), f32("be1"),
        bf("w1"), f32("b1"), bf("w2"), f32("b2"),
        f32("g2"), f32("be2"),
        wc_pad, bc_pad,
    ]

    def full(a):
        nd = a.ndim
        return pl.BlockSpec(a.shape, lambda b, _nd=nd: (0,) * _nd)

    probs_pad = pl.pallas_call(
        functools.partial(encoder_cls_kernel,
                          num_heads=num_heads, n_classes=C),
        out_shape=jax.ShapeDtypeStruct((B, 1, c_pad), jnp.float32),
        grid=(B,),
        in_specs=[pl.BlockSpec((1, S, H), lambda b: (b, 0, 0))]
                 + [full(w) for w in weights],
        out_specs=pl.BlockSpec((1, 1, c_pad), lambda b: (b, 0, 0)),
        compiler_params=pltpu.CompilerParams(
            dimension_semantics=("parallel",),
            vmem_limit_bytes=48 * 1024 * 1024),
    )(x, *weights)

    return probs_pad[:, 0, :C]                   # (B, C)


# ---------------------------------------------------------------------------
# Deterministic parameter construction
# ---------------------------------------------------------------------------
def make_params(key, *, vocab, seq, hidden, ffn, n_classes):
    ks = jax.random.split(key, 12)
    n = lambda k, shape: (0.02 * jax.random.normal(k, shape)).astype(jnp.float32)
    ones = lambda shape: jnp.ones(shape, jnp.float32)
    zeros = lambda shape: jnp.zeros(shape, jnp.float32)
    return {
        "tok_emb": n(ks[0], (vocab, hidden)),
        "pos_emb": n(ks[1], (seq, hidden)),
        "wq": n(ks[2], (hidden, hidden)), "bq": zeros((1, hidden)),
        "wk": n(ks[3], (hidden, hidden)), "bk": zeros((1, hidden)),
        "wv": n(ks[4], (hidden, hidden)), "bv": zeros((1, hidden)),
        "wo": n(ks[5], (hidden, hidden)), "bo": zeros((1, hidden)),
        "g1": ones((1, hidden)), "be1": zeros((1, hidden)),
        "w1": n(ks[6], (hidden, ffn)), "b1": zeros((1, ffn)),
        "w2": n(ks[7], (ffn, hidden)), "b2": zeros((1, hidden)),
        "g2": ones((1, hidden)), "be2": zeros((1, hidden)),
        "wc": n(ks[8], (hidden, n_classes)), "bc": zeros((1, n_classes)),
    }


if __name__ == "__main__":
    B, S, H, NH, F, C, VOCAB = 2, 8, 32, 2, 64, 5, 100

    key = jax.random.PRNGKey(0)
    k_param, k_ids = jax.random.split(key)
    params = make_params(k_param, vocab=VOCAB, seq=S, hidden=H, ffn=F,
                         n_classes=C)

    src = {
        "input_ids": jax.random.randint(k_ids, (B, S), 0, VOCAB,
                                        dtype=jnp.int32),
        "attention_mask": jnp.ones((B, S), jnp.int32),
    }

    probs = bert_to_goal_forward(src, params, num_heads=NH)
    probs = jax.block_until_ready(probs)

    assert probs.shape == (B, C)
    assert bool(jnp.all(jnp.abs(jnp.sum(probs, axis=-1) - 1.0) < 1e-4))
    assert bool(jnp.all(probs >= 0.0))
    print("KERNEL_OK")
</pallas_src>

<mosaic_0001>
module attributes {stable_mosaic.version = 11 : i64} {
  func.func @encoder_cls_kernel(%arg0: i32, %arg1: memref<1x8x32xbf16, #tpu.memory_space<vmem>>, %arg2: memref<32x32xbf16, #tpu.memory_space<vmem>>, %arg3: memref<1x32xf32, #tpu.memory_space<vmem>>, %arg4: memref<32x32xbf16, #tpu.memory_space<vmem>>, %arg5: memref<1x32xf32, #tpu.memory_space<vmem>>, %arg6: memref<32x32xbf16, #tpu.memory_space<vmem>>, %arg7: memref<1x32xf32, #tpu.memory_space<vmem>>, %arg8: memref<32x32xbf16, #tpu.memory_space<vmem>>, %arg9: memref<1x32xf32, #tpu.memory_space<vmem>>, %arg10: memref<1x32xf32, #tpu.memory_space<vmem>>, %arg11: memref<1x32xf32, #tpu.memory_space<vmem>>, %arg12: memref<32x64xbf16, #tpu.memory_space<vmem>>, %arg13: memref<1x64xf32, #tpu.memory_space<vmem>>, %arg14: memref<64x32xbf16, #tpu.memory_space<vmem>>, %arg15: memref<1x32xf32, #tpu.memory_space<vmem>>, %arg16: memref<1x32xf32, #tpu.memory_space<vmem>>, %arg17: memref<1x32xf32, #tpu.memory_space<vmem>>, %arg18: memref<32x128xbf16, #tpu.memory_space<vmem>>, %arg19: memref<1x128xf32, #tpu.memory_space<vmem>>, %arg20: memref<1x1x128xf32, #tpu.memory_space<vmem>>) attributes {dimension_semantics = [#tpu.dimension_semantics<parallel>], iteration_bounds = array<i64: 2>, scalar_prefetch = 0 : i64, scratch_operands = 0 : i64, tpu.core_type = #tpu.core_type<tc>, window_params = [{transform_indices = @transform_0, window_bounds = array<i64: 1, 8, 32>}, {pipeline_mode = #tpu.pipeline_mode<synchronous>, transform_indices = @transform_1, window_bounds = array<i64: 32, 32>}, {pipeline_mode = #tpu.pipeline_mode<synchronous>, transform_indices = @transform_2, window_bounds = array<i64: 1, 32>}, {pipeline_mode = #tpu.pipeline_mode<synchronous>, transform_indices = @transform_3, window_bounds = array<i64: 32, 32>}, {pipeline_mode = #tpu.pipeline_mode<synchronous>, transform_indices = @transform_4, window_bounds = array<i64: 1, 32>}, {pipeline_mode = #tpu.pipeline_mode<synchronous>, transform_indices = @transform_5, window_bounds = array<i64: 32, 32>}, {pipeline_mode = #tpu.pipeline_mode<synchronous>, transform_indices = @transform_6, window_bounds = array<i64: 1, 32>}, {pipeline_mode = #tpu.pipeline_mode<synchronous>, transform_indices = @transform_7, window_bounds = array<i64: 32, 32>}, {pipeline_mode = #tpu.pipeline_mode<synchronous>, transform_indices = @transform_8, window_bounds = array<i64: 1, 32>}, {pipeline_mode = #tpu.pipeline_mode<synchronous>, transform_indices = @transform_9, window_bounds = array<i64: 1, 32>}, {pipeline_mode = #tpu.pipeline_mode<synchronous>, transform_indices = @transform_10, window_bounds = array<i64: 1, 32>}, {pipeline_mode = #tpu.pipeline_mode<synchronous>, transform_indices = @transform_11, window_bounds = array<i64: 32, 64>}, {pipeline_mode = #tpu.pipeline_mode<synchronous>, transform_indices = @transform_12, window_bounds = array<i64: 1, 64>}, {pipeline_mode = #tpu.pipeline_mode<synchronous>, transform_indices = @transform_13, window_bounds = array<i64: 64, 32>}, {pipeline_mode = #tpu.pipeline_mode<synchronous>, transform_indices = @transform_14, window_bounds = array<i64: 1, 32>}, {pipeline_mode = #tpu.pipeline_mode<synchronous>, transform_indices = @transform_15, window_bounds = array<i64: 1, 32>}, {pipeline_mode = #tpu.pipeline_mode<synchronous>, transform_indices = @transform_16, window_bounds = array<i64: 1, 32>}, {pipeline_mode = #tpu.pipeline_mode<synchronous>, transform_indices = @transform_17, window_bounds = array<i64: 32, 128>}, {pipeline_mode = #tpu.pipeline_mode<synchronous>, transform_indices = @transform_18, window_bounds = array<i64: 1, 128>}, {transform_indices = @transform_19, window_bounds = array<i64: 1, 1, 128>}]} {
    %c0 = arith.constant 0 : index
    %c0_0 = arith.constant 0 : index
    %c0_1 = arith.constant 0 : index
    %0 = vector.load %arg1[%c0, %c0_0, %c0_1] : memref<1x8x32xbf16, #tpu.memory_space<vmem>>, vector<1x8x32xbf16>
    %1 = vector.shape_cast %0 : vector<1x8x32xbf16> to vector<8x32xbf16>
    %2 = vector.extract_strided_slice %1 {offsets = [1, 0], sizes = [1, 32], strides = [1, 1]} : vector<8x32xbf16> to vector<1x32xbf16>
    %c0_2 = arith.constant 0 : index
    %c0_3 = arith.constant 0 : index
    %3 = vector.load %arg4[%c0_2, %c0_3] : memref<32x32xbf16, #tpu.memory_space<vmem>>, vector<32x32xbf16>
    %cst = arith.constant dense<0.000000e+00> : vector<8x32xf32>
    %4 = tpu.matmul %1, %3, %cst {dimension_numbers = #tpu.dot_dimension_numbers<[1], [0], [0], [1], [0, 0, 1, 1], [], []>} : vector<8x32xbf16>, vector<32x32xbf16>, vector<8x32xf32> -> vector<8x32xf32>
    %c0_4 = arith.constant 0 : index
    %c0_5 = arith.constant 0 : index
    %5 = vector.load %arg5[%c0_4, %c0_5] : memref<1x32xf32, #tpu.memory_space<vmem>>, vector<1x32xf32>
    %6 = vector.broadcast %5 : vector<1x32xf32> to vector<8x32xf32>
    %7 = arith.addf %4, %6 : vector<8x32xf32>
    %8 = arith.truncf %7 : vector<8x32xf32> to vector<8x32xbf16>
    %c0_6 = arith.constant 0 : index
    %c0_7 = arith.constant 0 : index
    %9 = vector.load %arg6[%c0_6, %c0_7] : memref<32x32xbf16, #tpu.memory_space<vmem>>, vector<32x32xbf16>
    %cst_8 = arith.constant dense<0.000000e+00> : vector<8x32xf32>
    %10 = tpu.matmul %1, %9, %cst_8 {dimension_numbers = #tpu.dot_dimension_numbers<[1], [0], [0], [1], [0, 0, 1, 1], [], []>} : vector<8x32xbf16>, vector<32x32xbf16>, vector<8x32xf32> -> vector<8x32xf32>
    %c0_9 = arith.constant 0 : index
    %c0_10 = arith.constant 0 : index
    %11 = vector.load %arg7[%c0_9, %c0_10] : memref<1x32xf32, #tpu.memory_space<vmem>>, vector<1x32xf32>
    %12 = vector.broadcast %11 : vector<1x32xf32> to vector<8x32xf32>
    %13 = arith.addf %10, %12 : vector<8x32xf32>
    %14 = arith.truncf %13 : vector<8x32xf32> to vector<8x32xbf16>
    %c0_11 = arith.constant 0 : index
    %c0_12 = arith.constant 0 : index
    %15 = vector.load %arg2[%c0_11, %c0_12] : memref<32x32xbf16, #tpu.memory_space<vmem>>, vector<32x32xbf16>
    %cst_13 = arith.constant dense<0.000000e+00> : vector<1x32xf32>
    %16 = tpu.matmul %2, %15, %cst_13 {dimension_numbers = #tpu.dot_dimension_numbers<[1], [0], [0], [1], [0, 0, 1, 1], [], []>} : vector<1x32xbf16>, vector<32x32xbf16>, vector<1x32xf32> -> vector<1x32xf32>
    %c0_14 = arith.constant 0 : index
    %c0_15 = arith.constant 0 : index
    %17 = vector.load %arg3[%c0_14, %c0_15] : memref<1x32xf32, #tpu.memory_space<vmem>>, vector<1x32xf32>
    %18 = arith.addf %16, %17 : vector<1x32xf32>
    %19 = arith.truncf %18 : vector<1x32xf32> to vector<1x32xbf16>
    %cst_16 = arith.constant 0.000000e+00 : f32
    %20 = vector.broadcast %cst_16 : f32 to vector<1x32xf32>
    %21 = vector.extract_strided_slice %19 {offsets = [0, 0], sizes = [1, 16], strides = [1, 1]} : vector<1x32xbf16> to vector<1x16xbf16>
    %22 = vector.extract_strided_slice %8 {offsets = [0, 0], sizes = [8, 16], strides = [1, 1]} : vector<8x32xbf16> to vector<8x16xbf16>
    %cst_17 = arith.constant dense<0.000000e+00> : vector<1x8xf32>
    %23 = tpu.matmul %21, %22, %cst_17 {dimension_numbers = #tpu.dot_dimension_numbers<[1], [1], [0], [0], [0, 0, 1, 0], [], []>} : vector<1x16xbf16>, vector<8x16xbf16>, vector<1x8xf32> -> vector<1x8xf32>
    %cst_18 = arith.constant 2.500000e-01 : f32
    %24 = vector.broadcast %cst_18 : f32 to vector<1x8xf32>
    %25 = arith.mulf %23, %24 : vector<1x8xf32>
    %cst_19 = arith.constant dense<0xFF800000> : vector<1xf32>
    %26 = vector.multi_reduction <maximumf>, %25, %cst_19 [1] : vector<1x8xf32> to vector<1xf32>
    %27 = vector.shape_cast %26 : vector<1xf32> to vector<1x1xf32>
    %28 = vector.broadcast %27 : vector<1x1xf32> to vector<1x8xf32>
    %29 = arith.subf %25, %28 : vector<1x8xf32>
    %30 = math.exp %29 : vector<1x8xf32>
    %cst_20 = arith.constant dense<0.000000e+00> : vector<1xf32>
    %31 = vector.multi_reduction <add>, %30, %cst_20 [1] : vector<1x8xf32> to vector<1xf32>
    %32 = vector.shape_cast %31 : vector<1xf32> to vector<1x1xf32>
    %33 = tpu.reciprocal %32 {approx = true} : vector<1x1xf32> -> vector<1x1xf32>
    %34 = vector.broadcast %33 : vector<1x1xf32> to vector<1x8xf32>
    %35 = arith.mulf %30, %34 : vector<1x8xf32>
    %36 = arith.truncf %35 : vector<1x8xf32> to vector<1x8xbf16>
    %37 = vector.extract_strided_slice %14 {offsets = [0, 0], sizes = [8, 16], strides = [1, 1]} : vector<8x32xbf16> to vector<8x16xbf16>
    %cst_21 = arith.constant dense<0.000000e+00> : vector<1x16xf32>
    %38 = tpu.matmul %36, %37, %cst_21 {dimension_numbers = #tpu.dot_dimension_numbers<[1], [0], [0], [1], [0, 0, 1, 1], [], []>} : vector<1x8xbf16>, vector<8x16xbf16>, vector<1x16xf32> -> vector<1x16xf32>
    %39 = arith.truncf %38 : vector<1x16xf32> to vector<1x16xbf16>
    %c0_22 = arith.constant 0 : index
    %c0_23 = arith.constant 0 : index
    %40 = vector.load %arg8[%c0_22, %c0_23] : memref<32x32xbf16, #tpu.memory_space<vmem>>, vector<16x32xbf16>
    %cst_24 = arith.constant dense<0.000000e+00> : vector<1x32xf32>
    %41 = tpu.matmul %39, %40, %cst_24 {dimension_numbers = #tpu.dot_dimension_numbers<[1], [0], [0], [1], [0, 0, 1, 1], [], []>} : vector<1x16xbf16>, vector<16x32xbf16>, vector<1x32xf32> -> vector<1x32xf32>
    %42 = arith.addf %20, %41 : vector<1x32xf32>
    %43 = vector.extract_strided_slice %19 {offsets = [0, 16], sizes = [1, 16], strides = [1, 1]} : vector<1x32xbf16> to vector<1x16xbf16>
    %44 = vector.extract_strided_slice %8 {offsets = [0, 16], sizes = [8, 16], strides = [1, 1]} : vector<8x32xbf16> to vector<8x16xbf16>
    %cst_25 = arith.constant dense<0.000000e+00> : vector<1x8xf32>
    %45 = tpu.matmul %43, %44, %cst_25 {dimension_numbers = #tpu.dot_dimension_numbers<[1], [1], [0], [0], [0, 0, 1, 0], [], []>} : vector<1x16xbf16>, vector<8x16xbf16>, vector<1x8xf32> -> vector<1x8xf32>
    %cst_26 = arith.constant 2.500000e-01 : f32
    %46 = vector.broadcast %cst_26 : f32 to vector<1x8xf32>
    %47 = arith.mulf %45, %46 : vector<1x8xf32>
    %cst_27 = arith.constant dense<0xFF800000> : vector<1xf32>
    %48 = vector.multi_reduction <maximumf>, %47, %cst_27 [1] : vector<1x8xf32> to vector<1xf32>
    %49 = vector.shape_cast %48 : vector<1xf32> to vector<1x1xf32>
    %50 = vector.broadcast %49 : vector<1x1xf32> to vector<1x8xf32>
    %51 = arith.subf %47, %50 : vector<1x8xf32>
    %52 = math.exp %51 : vector<1x8xf32>
    %cst_28 = arith.constant dense<0.000000e+00> : vector<1xf32>
    %53 = vector.multi_reduction <add>, %52, %cst_28 [1] : vector<1x8xf32> to vector<1xf32>
    %54 = vector.shape_cast %53 : vector<1xf32> to vector<1x1xf32>
    %55 = tpu.reciprocal %54 {approx = true} : vector<1x1xf32> -> vector<1x1xf32>
    %56 = vector.broadcast %55 : vector<1x1xf32> to vector<1x8xf32>
    %57 = arith.mulf %52, %56 : vector<1x8xf32>
    %58 = arith.truncf %57 : vector<1x8xf32> to vector<1x8xbf16>
    %59 = vector.extract_strided_slice %14 {offsets = [0, 16], sizes = [8, 16], strides = [1, 1]} : vector<8x32xbf16> to vector<8x16xbf16>
    %cst_29 = arith.constant dense<0.000000e+00> : vector<1x16xf32>
    %60 = tpu.matmul %58, %59, %cst_29 {dimension_numbers = #tpu.dot_dimension_numbers<[1], [0], [0], [1], [0, 0, 1, 1], [], []>} : vector<1x8xbf16>, vector<8x16xbf16>, vector<1x16xf32> -> vector<1x16xf32>
    %61 = arith.truncf %60 : vector<1x16xf32> to vector<1x16xbf16>
    %c16 = arith.constant 16 : index
    %c0_30 = arith.constant 0 : index
    %62 = vector.load %arg8[%c16, %c0_30] : memref<32x32xbf16, #tpu.memory_space<vmem>>, vector<16x32xbf16>
    %cst_31 = arith.constant dense<0.000000e+00> : vector<1x32xf32>
    %63 = tpu.matmul %61, %62, %cst_31 {dimension_numbers = #tpu.dot_dimension_numbers<[1], [0], [0], [1], [0, 0, 1, 1], [], []>} : vector<1x16xbf16>, vector<16x32xbf16>, vector<1x32xf32> -> vector<1x32xf32>
    %64 = arith.addf %42, %63 : vector<1x32xf32>
    %c0_32 = arith.constant 0 : index
    %c0_33 = arith.constant 0 : index
    %65 = vector.load %arg9[%c0_32, %c0_33] : memref<1x32xf32, #tpu.memory_space<vmem>>, vector<1x32xf32>
    %66 = arith.addf %64, %65 : vector<1x32xf32>
    %67 = arith.extf %2 : vector<1x32xbf16> to vector<1x32xf32>
    %68 = arith.addf %67, %66 : vector<1x32xf32>
    %c0_34 = arith.constant 0 : index
    %c0_35 = arith.constant 0 : index
    %69 = vector.load %arg10[%c0_34, %c0_35] : memref<1x32xf32, #tpu.memory_space<vmem>>, vector<1x32xf32>
    %c0_36 = arith.constant 0 : index
    %c0_37 = arith.constant 0 : index
    %70 = vector.load %arg11[%c0_36, %c0_37] : memref<1x32xf32, #tpu.memory_space<vmem>>, vector<1x32xf32>
    %cst_38 = arith.constant dense<0.000000e+00> : vector<1xf32>
    %71 = vector.multi_reduction <add>, %68, %cst_38 [1] : vector<1x32xf32> to vector<1xf32>
    %72 = vector.shape_cast %71 : vector<1xf32> to vector<1x1xf32>
    %cst_39 = arith.constant 3.200000e+01 : f32
    %73 = vector.broadcast %cst_39 : f32 to vector<1x1xf32>
    %74 = arith.divf %72, %73 : vector<1x1xf32>
    %75 = vector.broadcast %74 : vector<1x1xf32> to vector<1x32xf32>
    %76 = arith.subf %68, %75 : vector<1x32xf32>
    %77 = arith.mulf %76, %76 : vector<1x32xf32>
    %cst_40 = arith.constant dense<0.000000e+00> : vector<1xf32>
    %78 = vector.multi_reduction <add>, %77, %cst_40 [1] : vector<1x32xf32> to vector<1xf32>
    %79 = vector.shape_cast %78 : vector<1xf32> to vector<1x1xf32>
    %cst_41 = arith.constant 3.200000e+01 : f32
    %80 = vector.broadcast %cst_41 : f32 to vector<1x1xf32>
    %81 = arith.divf %79, %80 : vector<1x1xf32>
    %82 = vector.broadcast %74 : vector<1x1xf32> to vector<1x32xf32>
    %83 = arith.subf %68, %82 : vector<1x32xf32>
    %cst_42 = arith.constant 9.99999996E-13 : f32
    %84 = vector.broadcast %cst_42 : f32 to vector<1x1xf32>
    %85 = arith.addf %81, %84 : vector<1x1xf32>
    %86 = math.rsqrt %85 : vector<1x1xf32>
    %87 = vector.broadcast %86 : vector<1x1xf32> to vector<1x32xf32>
    %88 = arith.mulf %83, %87 : vector<1x32xf32>
    %89 = arith.mulf %88, %69 : vector<1x32xf32>
    %90 = arith.addf %89, %70 : vector<1x32xf32>
    %91 = arith.truncf %90 : vector<1x32xf32> to vector<1x32xbf16>
    %c0_43 = arith.constant 0 : index
    %c0_44 = arith.constant 0 : index
    %92 = vector.load %arg12[%c0_43, %c0_44] : memref<32x64xbf16, #tpu.memory_space<vmem>>, vector<32x64xbf16>
    %cst_45 = arith.constant dense<0.000000e+00> : vector<1x64xf32>
    %93 = tpu.matmul %91, %92, %cst_45 {dimension_numbers = #tpu.dot_dimension_numbers<[1], [0], [0], [1], [0, 0, 1, 1], [], []>} : vector<1x32xbf16>, vector<32x64xbf16>, vector<1x64xf32> -> vector<1x64xf32>
    %c0_46 = arith.constant 0 : index
    %c0_47 = arith.constant 0 : index
    %94 = vector.load %arg13[%c0_46, %c0_47] : memref<1x64xf32, #tpu.memory_space<vmem>>, vector<1x64xf32>
    %95 = arith.addf %93, %94 : vector<1x64xf32>
    %96 = arith.mulf %95, %95 : vector<1x64xf32>
    %97 = arith.mulf %95, %96 : vector<1x64xf32>
    %cst_48 = arith.constant 4.471500e-02 : f32
    %98 = vector.broadcast %cst_48 : f32 to vector<1x64xf32>
    %99 = arith.mulf %98, %97 : vector<1x64xf32>
    %100 = arith.addf %95, %99 : vector<1x64xf32>
    %cst_49 = arith.constant 0.797884583 : f32
    %101 = vector.broadcast %cst_49 : f32 to vector<1x64xf32>
    %102 = arith.mulf %101, %100 : vector<1x64xf32>
    %103 = math.tanh %102 : vector<1x64xf32>
    %cst_50 = arith.constant 1.000000e+00 : f32
    %104 = vector.broadcast %cst_50 : f32 to vector<1x64xf32>
    %105 = arith.addf %104, %103 : vector<1x64xf32>
    %cst_51 = arith.constant 5.000000e-01 : f32
    %106 = vector.broadcast %cst_51 : f32 to vector<1x64xf32>
    %107 = arith.mulf %106, %105 : vector<1x64xf32>
    %108 = arith.mulf %95, %107 : vector<1x64xf32>
    %109 = arith.truncf %108 : vector<1x64xf32> to vector<1x64xbf16>
    %c0_52 = arith.constant 0 : index
    %c0_53 = arith.constant 0 : index
    %110 = vector.load %arg14[%c0_52, %c0_53] : memref<64x32xbf16, #tpu.memory_space<vmem>>, vector<64x32xbf16>
    %cst_54 = arith.constant dense<0.000000e+00> : vector<1x32xf32>
    %111 = tpu.matmul %109, %110, %cst_54 {dimension_numbers = #tpu.dot_dimension_numbers<[1], [0], [0], [1], [0, 0, 1, 1], [], []>} : vector<1x64xbf16>, vector<64x32xbf16>, vector<1x32xf32> -> vector<1x32xf32>
    %c0_55 = arith.constant 0 : index
    %c0_56 = arith.constant 0 : index
    %112 = vector.load %arg15[%c0_55, %c0_56] : memref<1x32xf32, #tpu.memory_space<vmem>>, vector<1x32xf32>
    %113 = arith.addf %111, %112 : vector<1x32xf32>
    %114 = arith.addf %90, %113 : vector<1x32xf32>
    %c0_57 = arith.constant 0 : index
    %c0_58 = arith.constant 0 : index
    %115 = vector.load %arg16[%c0_57, %c0_58] : memref<1x32xf32, #tpu.memory_space<vmem>>, vector<1x32xf32>
    %c0_59 = arith.constant 0 : index
    %c0_60 = arith.constant 0 : index
    %116 = vector.load %arg17[%c0_59, %c0_60] : memref<1x32xf32, #tpu.memory_space<vmem>>, vector<1x32xf32>
    %cst_61 = arith.constant dense<0.000000e+00> : vector<1xf32>
    %117 = vector.multi_reduction <add>, %114, %cst_61 [1] : vector<1x32xf32> to vector<1xf32>
    %118 = vector.shape_cast %117 : vector<1xf32> to vector<1x1xf32>
    %cst_62 = arith.constant 3.200000e+01 : f32
    %119 = vector.broadcast %cst_62 : f32 to vector<1x1xf32>
    %120 = arith.divf %118, %119 : vector<1x1xf32>
    %121 = vector.broadcast %120 : vector<1x1xf32> to vector<1x32xf32>
    %122 = arith.subf %114, %121 : vector<1x32xf32>
    %123 = arith.mulf %122, %122 : vector<1x32xf32>
    %cst_63 = arith.constant dense<0.000000e+00> : vector<1xf32>
    %124 = vector.multi_reduction <add>, %123, %cst_63 [1] : vector<1x32xf32> to vector<1xf32>
    %125 = vector.shape_cast %124 : vector<1xf32> to vector<1x1xf32>
    %cst_64 = arith.constant 3.200000e+01 : f32
    %126 = vector.broadcast %cst_64 : f32 to vector<1x1xf32>
    %127 = arith.divf %125, %126 : vector<1x1xf32>
    %128 = vector.broadcast %120 : vector<1x1xf32> to vector<1x32xf32>
    %129 = arith.subf %114, %128 : vector<1x32xf32>
    %cst_65 = arith.constant 9.99999996E-13 : f32
    %130 = vector.broadcast %cst_65 : f32 to vector<1x1xf32>
    %131 = arith.addf %127, %130 : vector<1x1xf32>
    %132 = math.rsqrt %131 : vector<1x1xf32>
    %133 = vector.broadcast %132 : vector<1x1xf32> to vector<1x32xf32>
    %134 = arith.mulf %129, %133 : vector<1x32xf32>
    %135 = arith.mulf %134, %115 : vector<1x32xf32>
    %136 = arith.addf %135, %116 : vector<1x32xf32>
    %137 = arith.truncf %136 : vector<1x32xf32> to vector<1x32xbf16>
    %c0_66 = arith.constant 0 : index
    %c0_67 = arith.constant 0 : index
    %138 = vector.load %arg18[%c0_66, %c0_67] : memref<32x128xbf16, #tpu.memory_space<vmem>>, vector<32x128xbf16>
    %cst_68 = arith.constant dense<0.000000e+00> : vector<1x128xf32>
    %139 = tpu.matmul %137, %138, %cst_68 {dimension_numbers = #tpu.dot_dimension_numbers<[1], [0], [0], [1], [0, 0, 1, 1], [], []>} : vector<1x32xbf16>, vector<32x128xbf16>, vector<1x128xf32> -> vector<1x128xf32>
    %c0_69 = arith.constant 0 : index
    %c0_70 = arith.constant 0 : index
    %140 = vector.load %arg19[%c0_69, %c0_70] : memref<1x128xf32, #tpu.memory_space<vmem>>, vector<1x128xf32>
    %141 = arith.addf %139, %140 : vector<1x128xf32>
    %142 = tpu.iota {dimensions = array<i32: 1>} : vector<1x128xi32>
    %c5_i32 = arith.constant 5 : i32
    %143 = vector.broadcast %c5_i32 : i32 to vector<1x128xi32>
    %144 = arith.cmpi slt, %142, %143 : vector<1x128xi32>
    %cst_71 = arith.constant -1.000000e+30 : f32
    %145 = vector.broadcast %cst_71 : f32 to vector<1x128xf32>
    %146 = arith.select %144, %141, %145 : vector<1x128xi1>, vector<1x128xf32>
    %cst_72 = arith.constant dense<0xFF800000> : vector<1xf32>
    %147 = vector.multi_reduction <maximumf>, %146, %cst_72 [1] : vector<1x128xf32> to vector<1xf32>
    %148 = vector.shape_cast %147 : vector<1xf32> to vector<1x1xf32>
    %149 = vector.broadcast %148 : vector<1x1xf32> to vector<1x128xf32>
    %150 = arith.subf %146, %149 : vector<1x128xf32>
    %151 = math.exp %150 : vector<1x128xf32>
    %cst_73 = arith.constant dense<0.000000e+00> : vector<1xf32>
    %152 = vector.multi_reduction <add>, %151, %cst_73 [1] : vector<1x128xf32> to vector<1xf32>
    %153 = vector.shape_cast %152 : vector<1xf32> to vector<1x1xf32>
    %154 = vector.broadcast %153 : vector<1x1xf32> to vector<1x128xf32>
    %155 = arith.divf %151, %154 : vector<1x128xf32>
    %c0_74 = arith.constant 0 : index
    %c0_75 = arith.constant 0 : index
    %c0_76 = arith.constant 0 : index
    %156 = vector.load %arg20[%c0_74, %c0_75, %c0_76] : memref<1x1x128xf32, #tpu.memory_space<vmem>>, vector<1x1x128xf32>
    %157 = vector.shape_cast %156 : vector<1x1x128xf32> to vector<1x128xf32>
    %158 = vector.shape_cast %155 : vector<1x128xf32> to vector<1x1x128xf32>
    tpu.vector_store %arg20[%c0_74, %c0_75, %c0_76], %158 {strides = array<i32>} : memref<1x1x128xf32, #tpu.memory_space<vmem>>, vector<1x1x128xf32>,
    return
  }
  func.func @transform_0(%arg0: i32) -> (i32, i32, i32) {
    %c0_i32 = arith.constant 0 : i32
    %c0_i32_0 = arith.constant 0 : i32
    %c0_i32_1 = arith.constant 0 : i32
    return %arg0, %c0_i32, %c0_i32_0 : i32, i32, i32
  }
  func.func @transform_1(%arg0: i32) -> (i32, i32) {
    %c0_i32 = arith.constant 0 : i32
    %c0_i32_0 = arith.constant 0 : i32
    %c0_i32_1 = arith.constant 0 : i32
    return %c0_i32, %c0_i32_0 : i32, i32
  }
  func.func @transform_2(%arg0: i32) -> (i32, i32) {
    %c0_i32 = arith.constant 0 : i32
    %c0_i32_0 = arith.constant 0 : i32
    %c0_i32_1 = arith.constant 0 : i32
    return %c0_i32, %c0_i32_0 : i32, i32
  }
  func.func @transform_3(%arg0: i32) -> (i32, i32) {
    %c0_i32 = arith.constant 0 : i32
    %c0_i32_0 = arith.constant 0 : i32
    %c0_i32_1 = arith.constant 0 : i32
    return %c0_i32, %c0_i32_0 : i32, i32
  }
  func.func @transform_4(%arg0: i32) -> (i32, i32) {
    %c0_i32 = arith.constant 0 : i32
    %c0_i32_0 = arith.constant 0 : i32
    %c0_i32_1 = arith.constant 0 : i32
    return %c0_i32, %c0_i32_0 : i32, i32
  }
  func.func @transform_5(%arg0: i32) -> (i32, i32) {
    %c0_i32 = arith.constant 0 : i32
    %c0_i32_0 = arith.constant 0 : i32
    %c0_i32_1 = arith.constant 0 : i32
    return %c0_i32, %c0_i32_0 : i32, i32
  }
  func.func @transform_6(%arg0: i32) -> (i32, i32) {
    %c0_i32 = arith.constant 0 : i32
    %c0_i32_0 = arith.constant 0 : i32
    %c0_i32_1 = arith.constant 0 : i32
    return %c0_i32, %c0_i32_0 : i32, i32
  }
  func.func @transform_7(%arg0: i32) -> (i32, i32) {
    %c0_i32 = arith.constant 0 : i32
    %c0_i32_0 = arith.constant 0 : i32
    %c0_i32_1 = arith.constant 0 : i32
    return %c0_i32, %c0_i32_0 : i32, i32
  }
  func.func @transform_8(%arg0: i32) -> (i32, i32) {
    %c0_i32 = arith.constant 0 : i32
    %c0_i32_0 = arith.constant 0 : i32
    %c0_i32_1 = arith.constant 0 : i32
    return %c0_i32, %c0_i32_0 : i32, i32
  }
  func.func @transform_9(%arg0: i32) -> (i32, i32) {
    %c0_i32 = arith.constant 0 : i32
    %c0_i32_0 = arith.constant 0 : i32
    %c0_i32_1 = arith.constant 0 : i32
    return %c0_i32, %c0_i32_0 : i32, i32
  }
  func.func @transform_10(%arg0: i32) -> (i32, i32) {
    %c0_i32 = arith.constant 0 : i32
    %c0_i32_0 = arith.constant 0 : i32
    %c0_i32_1 = arith.constant 0 : i32
    return %c0_i32, %c0_i32_0 : i32, i32
  }
  func.func @transform_11(%arg0: i32) -> (i32, i32) {
    %c0_i32 = arith.constant 0 : i32
    %c0_i32_0 = arith.constant 0 : i32
    %c0_i32_1 = arith.constant 0 : i32
    return %c0_i32, %c0_i32_0 : i32, i32
  }
  func.func @transform_12(%arg0: i32) -> (i32, i32) {
    %c0_i32 = arith.constant 0 : i32
    %c0_i32_0 = arith.constant 0 : i32
    %c0_i32_1 = arith.constant 0 : i32
    return %c0_i32, %c0_i32_0 : i32, i32
  }
  func.func @transform_13(%arg0: i32) -> (i32, i32) {
    %c0_i32 = arith.constant 0 : i32
    %c0_i32_0 = arith.constant 0 : i32
    %c0_i32_1 = arith.constant 0 : i32
    return %c0_i32, %c0_i32_0 : i32, i32
  }
  func.func @transform_14(%arg0: i32) -> (i32, i32) {
    %c0_i32 = arith.constant 0 : i32
    %c0_i32_0 = arith.constant 0 : i32
    %c0_i32_1 = arith.constant 0 : i32
    return %c0_i32, %c0_i32_0 : i32, i32
  }
  func.func @transform_15(%arg0: i32) -> (i32, i32) {
    %c0_i32 = arith.constant 0 : i32
    %c0_i32_0 = arith.constant 0 : i32
    %c0_i32_1 = arith.constant 0 : i32
    return %c0_i32, %c0_i32_0 : i32, i32
  }
  func.func @transform_16(%arg0: i32) -> (i32, i32) {
    %c0_i32 = arith.constant 0 : i32
    %c0_i32_0 = arith.constant 0 : i32
    %c0_i32_1 = arith.constant 0 : i32
    return %c0_i32, %c0_i32_0 : i32, i32
  }
  func.func @transform_17(%arg0: i32) -> (i32, i32) {
    %c0_i32 = arith.constant 0 : i32
    %c0_i32_0 = arith.constant 0 : i32
    %c0_i32_1 = arith.constant 0 : i32
    return %c0_i32, %c0_i32_0 : i32, i32
  }
  func.func @transform_18(%arg0: i32) -> (i32, i32) {
    %c0_i32 = arith.constant 0 : i32
    %c0_i32_0 = arith.constant 0 : i32
    %c0_i32_1 = arith.constant 0 : i32
    return %c0_i32, %c0_i32_0 : i32, i32
  }
  func.func @transform_19(%arg0: i32) -> (i32, i32, i32) {
    %c0_i32 = arith.constant 0 : i32
    %c0_i32_0 = arith.constant 0 : i32
    %c0_i32_1 = arith.constant 0 : i32
    return %arg0, %c0_i32, %c0_i32_0 : i32, i32, i32
  }
}

</mosaic_0001>

<bundles_post_ra>
// kernel: tpu_custom_call.1
= control target key start
LH: loop header
LB: loop body
LE: loop exit
PB: predicated region body
PF: predicated region fallthrough
CT: control target
= control target key end

     0   :  { %s2741_s0 = inlined_call_operand.hbm [shape: bf16[2,8,32], index: 0, kind: input, shape index: {}]   ;;  %s2742_s1 = inlined_call_operand.vmem [shape: bf16[32,32], index: 1, kind: input, shape index: {}]   ;;  %s2743_s2 = inlined_call_operand.hbm [shape: f32[1,32], index: 2, kind: input, shape index: {}]   ;;  %s2744_s3 = inlined_call_operand.vmem [shape: bf16[32,32], index: 3, kind: input, shape index: {}]   ;;  %s2745_s4 = inlined_call_operand.hbm [shape: f32[1,32], index: 4, kind: input, shape index: {}]   ;;  %s2746_s5 = inlined_call_operand.vmem [shape: bf16[32,32], index: 5, kind: input, shape index: {}]   ;;  %s2747_s6 = inlined_call_operand.hbm [shape: f32[1,32], index: 6, kind: input, shape index: {}]   ;;  %s2748_s7 = inlined_call_operand.hbm [shape: bf16[32,32], index: 7, kind: input, shape index: {}]   ;;  %s2749_s8 = inlined_call_operand.hbm [shape: f32[1,32], index: 8, kind: input, shape index: {}]   ;;  %s2750_s9 = inlined_call_operand.hbm [shape: f32[1,32], index: 9, kind: input, shape index: {}]   ;;  %s2751_s10 = inlined_call_operand.hbm [shape: f32[1,32], index: 10, kind: input, shape index: {}]   ;;  %s2752_s11 = inlined_call_operand.hbm [shape: bf16[32,64], index: 11, kind: input, shape index: {}]   ;;  %s2753_s12 = inlined_call_operand.hbm [shape: f32[1,64], index: 12, kind: input, shape index: {}]   ;;  %s2754_s13 = inlined_call_operand.vmem [shape: bf16[64,32], index: 13, kind: input, shape index: {}]   ;;  %s2755_s14 = inlined_call_operand.hbm [shape: f32[1,32], index: 14, kind: input, shape index: {}]   ;;  %s2756_s15 = inlined_call_operand.hbm [shape: f32[1,32], index: 15, kind: input, shape index: {}]   ;;  %s2757_s16 = inlined_call_operand.hbm [shape: f32[1,32], index: 16, kind: input, shape index: {}]   ;;  %s2758_s17 = inlined_call_operand.vmem [shape: bf16[32,128], index: 17, kind: input, shape index: {}]   ;;  %s2759_s18 = inlined_call_operand.vmem [shape: f32[1,128], index: 18, kind: input, shape index: {}]   ;;  %s2760_s19 = inlined_call_operand.hbm [shape: f32[2,1,128], index: 19, kind: output, shape index: {}]  }
   0x1   :  { %2767 = sst [smem:[#allocation32_spill]] %s2741_s0 }
   0x2   :  { %2768 = sst [smem:[#allocation33_spill]] %s2742_s1 }
   0x3   :  { %2769 = sst [smem:[#allocation34_spill]] %s2743_s2 }
   0x4   :  { %2770 = sst [smem:[#allocation35_spill]] %s2744_s3 }
   0x5   :  { %2771 = sst [smem:[#allocation36_spill]] %s2745_s4 }
   0x6   :  { %2772 = sst [smem:[#allocation37_spill]] %s2747_s6 }
   0x7   :  { %2773 = sst [smem:[#allocation38_spill]] %s2748_s7 }
   0x8   :  { %2774 = sst [smem:[#allocation39_spill]] %s2749_s8 }
   0x9   :  { %2775 = sst [smem:[#allocation40_spill]] %s2750_s9 }
   0xa   :  { %2776 = sst [smem:[#allocation41_spill]] %s2751_s10 }
   0xb   :  { %2777 = sst [smem:[#allocation42_spill]] %s2752_s11 }
   0xc   :  { %2778 = sst [smem:[#allocation43_spill]] %s2754_s13 }
   0xd   :  { %2779 = sst [smem:[#allocation44_spill]] %s2758_s17 }
   0xe   :  { %2780 = sst [smem:[#allocation45_spill]] %s2759_s18 }
   0xf   :  { %2781 = sst [smem:[#allocation46_spill]] %s2760_s19 }
  0x10   :  { %24 = vsyncpa [#allocation3], 0 }
  0x11   :  { %26 = vsyncpa [#allocation3 + $0x1], 0 }
  0x12   :  { %27 = vsyncpa [#allocation6], 0 }
  0x13   :  { %28 = vsyncpa [#allocation9], 0 }
  0x14   :  { %29 = vsyncpa [#allocation12], 0 }
  0x15   :  { %30 = vsyncpa [#allocation15], 0 }
  0x16   :  { %31 = vsyncpa [#allocation18], 0 }
  0x17   :  { %32 = vsyncpa [#allocation21], 0 }
  0x18   :  { %33 = vsyncpa [#allocation4], 0 }
  0x19   :  { %35 = vsyncpa [#allocation4 + $0x1], 0  ;;  %s2442_s0 = smov 0   ;;  %s2444_s30 = smov 0  }
  0x1a   :  { %s2446_s20 = smov 0   ;;  %s2448_s21 = smov 0  }
  0x1b LB: > { %s2782_s2 = sld [smem:[#allocation34_spill]]  ;;  %s2466_s24 = sadd.s32 4294967295, %s2324_s21   ;;  %s2324_s21 = sphi %s2448_s21, %s2808_s21   ;;  %s2320_s20 = sphi %s2446_s20, %s2807_s20   ;;  %s2316_s30 = sphi %s2444_s30, %s2806_s30   ;;  %s2312_s0 = sphi %s2442_s0, %s2805_s0  }
  0x1c   : > { %p1523_p0 = scmp.ge.s32.totalorder %s2324_s21, 1  ;;  %p62_p1 = scmp.eq.s32.totalorder %s2466_s24, 0 }
  0x1d   : > { %p476_p2 = scmp.lt.s32.totalorder %s2324_s21, 3  ;;  %s2326_s3 = smov [#allocation5]  }
  0x1e   : > { %s493_s26 = sshll.u32 %s2326_s3, 4  ;;  %s2784_s6 = sld [smem:[#allocation37_spill]]  ;;  %s494_s26 = int_to_ptr.vmem [resolvable:$true] %s493_s26 }
  0x1f   : > { %p2471_p3 = pnand %p1523_p0, %p476_p2  ;;  %s2327_s22 = smov [#allocation8]  }
  0x20   : > { %s2786_s8 = sld [smem:[#allocation39_spill]]  ;;  %s2328_s17 = smov [#allocation11]  }
  0x21   : > { %s491_s23 = sshll.u32 %s2782_s2, 4  ;;  %p1699_p5 = pneg %p2471_p3  ;;  %s492_s23 = int_to_ptr.hbm [resolvable:$true] %s491_s23 }
  0x22   : > { %s523_s2 = sshll.u32 %s2327_s22, 4  ;;  %s2787_s10 = sld [smem:[#allocation41_spill]]  ;;  %s524_s2 = int_to_ptr.vmem [resolvable:$true] %s523_s2 }
  0x23   : > { %p2483_p6 = pnand %p1699_p5, %p62_p1  ;;  %s549_s13 = sshll.u32 %s2328_s17, 4  ;;  %s550_s13 = int_to_ptr.vmem [resolvable:$true] %s549_s13 }
  0x24   : > { %s521_s29 = sshll.u32 %s2784_s6, 4  ;;  %s2329_s22 = smov [#allocation14]   ;;  %s522_s29 = int_to_ptr.hbm [resolvable:$true] %s521_s29 }
  0x25   : > { %1702 = dma.hbm_to_vmem [thread:$0]  (!%p2483_p6), %s492_s23, 16, %s494_s26, [#allocation6]  }
  0x26   : > { %s547_s18 = sshll.u32 %s2786_s8, 4  ;;  %s573_s19 = sshll.u32 %s2329_s22, 4  ;;  %s548_s18 = int_to_ptr.hbm [resolvable:$true] %s547_s18  ;;  %s574_s19 = int_to_ptr.vmem [resolvable:$true] %s573_s19 }
  0x27   : > { %1708 = dma.hbm_to_vmem [thread:$0]  (!%p2483_p6), %s522_s29, 16, %s524_s2, [#allocation9]  }
  0x28   : > { %s571_s6 = sshll.u32 %s2787_s10, 4  ;;  %s597_s23 = sshll.u32 %s2753_s12, 4  ;;  %s572_s6 = int_to_ptr.hbm [resolvable:$true] %s571_s6  ;;  %s598_s23 = int_to_ptr.hbm [resolvable:$true] %s597_s23 }
  0x29   : > { %1714 = dma.hbm_to_vmem [thread:$0]  (!%p2483_p6), %s548_s18, 16, %s550_s13, [#allocation12]  }
  0x2a   : > { %1720 = dma.hbm_to_vmem [thread:$0]  (!%p2483_p6), %s572_s6, 16, %s574_s19, [#allocation15]  }
  0x2b   : > { %s624_s2 = sshll.u32 %s2756_s15, 4  ;;  %s2330_s17 = smov [#allocation17]   ;;  %s625_s2 = int_to_ptr.hbm [resolvable:$true] %s624_s2 }
  0x2c   : > { %s599_s27 = sshll.u32 %s2330_s17, 4  ;;  %s2331_s13 = smov [#allocation20]   ;;  %s600_s27 = int_to_ptr.vmem [resolvable:$true] %s599_s27 }
  0x2d   : > { %1726 = dma.hbm_to_vmem [thread:$0]  (!%p2483_p6), %s598_s23, 16, %s600_s27, [#allocation18]  }
  0x2e   : > { %s626_s18 = sshll.u32 %s2331_s13, 4  ;;  %s2788_s4 = sld [smem:[#allocation36_spill]]  ;;  %s627_s18 = int_to_ptr.vmem [resolvable:$true] %s626_s18 }
  0x2f   : > { %1732 = dma.hbm_to_vmem [thread:$0]  (!%p2483_p6), %s625_s2, 16, %s627_s18, [#allocation21]  }
  0x30   : > { %s2789_s7 = sld [smem:[#allocation38_spill]]  ;;  %s2332_s26 = smov [#allocation7]  }
  0x31   : > { %s508_s29 = sshll.u32 %s2332_s26, 4  ;;  %s2333_s23 = smov [#allocation10]   ;;  %s509_s29 = int_to_ptr.vmem [resolvable:$true] %s508_s29 }
  0x32   : > { %s534_s17 = sshll.u32 %s2333_s23, 4  ;;  %s2334_s27 = smov 64   ;;  %s535_s17 = int_to_ptr.vmem [resolvable:$true] %s534_s17 }
  0x33   : > { %s2335_s13 = smov 4   ;;  %s2790_s9 = sld [smem:[#allocation40_spill]] }
  0x34   : > { %s506_s22 = sshll.u32 %s2788_s4, 4  ;;  %s2336_s28 = smov [#allocation13]   ;;  %s507_s22 = int_to_ptr.hbm [resolvable:$true] %s506_s22 }
  0x35   : > { %1705 = dma.hbm_to_vmem [thread:$0]  (!%p2483_p6), %s507_s22, 16, %s509_s29, [#allocation6]  }
  0x36   : > { %s532_s3 = sshll.u32 %s2789_s7, 4  ;;  %s561_s6 = sshll.u32 %s2336_s28, 4  ;;  %s533_s3 = int_to_ptr.hbm [resolvable:$true] %s532_s3  ;;  %s562_s6 = int_to_ptr.vmem [resolvable:$true] %s561_s6 }
  0x37   : > { %1711 = dma.hbm_to_vmem [thread:$0]  (!%p2483_p6), %s533_s3, 256, %s535_s17, [#allocation9], %s2334_s27, %s2334_s27, %s2335_s13  }
  0x38   : > { %s2791_s11 = sld [smem:[#allocation42_spill]]  ;;  %s2337_s29 = smov [#allocation16]  }
  0x39   : > { %s559_s8 = sshll.u32 %s2790_s9, 4  ;;  %s584_s3 = sshll.u32 %s2337_s29, 4  ;;  %s560_s8 = int_to_ptr.hbm [resolvable:$true] %s559_s8  ;;  %s585_s3 = int_to_ptr.vmem [resolvable:$true] %s584_s3 }
  0x3a   : > { %1717 = dma.hbm_to_vmem [thread:$0]  (!%p2483_p6), %s560_s8, 16, %s562_s6, [#allocation12]  }
  0x3b   : > { %s612_s2 = sshll.u32 %s2755_s14, 4  ;;  %s636_s8 = sshll.u32 %s2757_s16, 4  ;;  %s613_s2 = int_to_ptr.hbm [resolvable:$true] %s612_s2  ;;  %s637_s8 = int_to_ptr.hbm [resolvable:$true] %s636_s8 }
  0x3c   : > { %s2338_s6 = smov [#allocation19]   ;;  %s2339_s26 = smov [#allocation22]  }
  0x3d   : > { %s614_s19 = sshll.u32 %s2338_s6, 4  ;;  %p55_p8 = scmp.ne.s32.totalorder %s2320_s20, %s2316_s30  ;;  %s615_s19 = int_to_ptr.vmem [resolvable:$true] %s614_s19 }
  0x3e   : > { %s582_s22 = sshll.u32 %s2791_s11, 4  ;;  %p56_p9 = scmp.eq.s32.totalorder %s2324_s21, 0  ;;  %s583_s22 = int_to_ptr.hbm [resolvable:$true] %s582_s22 }
  0x3f   : > { %1723 = dma.hbm_to_vmem [thread:$0]  (!%p2483_p6), %s583_s22, 256, %s585_s3, [#allocation15], %s2334_s27, %s2334_s27, %s2335_s13  }
  0x40   : > { %1729 = dma.hbm_to_vmem [thread:$0]  (!%p2483_p6), %s613_s2, 16, %s615_s19, [#allocation18]  }
  0x41   : > { %s638_s27 = sshll.u32 %s2339_s26, 4  ;;  %s1522_s13 = sadd.s32 4294967294, %s2324_s21   ;;  %s639_s27 = int_to_ptr.vmem [resolvable:$true] %s638_s27 }
  0x42   : > { %1735 = dma.hbm_to_vmem [thread:$0]  (!%p2483_p6), %s637_s8, 16, %s639_s27, [#allocation21]  }
  0x43   : > { %s2543_s22 = sadd.s32 1, %s2324_s21   ;;  %s48_s3 = sadd.s32 1, %s2320_s20 }
  0x44   : > { %s45_s29 = ssub.s32 %s2324_s21, %s2543_s22  ;;  %p61_p10 = scmp.ne.s32.totalorder %s2316_s30, %s2312_s0 }
  0x45   : > { %p46_p7 = scmp.eq.s32.totalorder %s45_s29, 0  ;;  %p2556_p11 = por %p56_p9, %p55_p8 }
  0x46   : > { %p2562_p12 = por %p62_p1, %p61_p10  ;;  %p463_p13 = scmp.eq.s32.totalorder %s2466_s24, 1 }
  0x47   : > { %s2554_s23 = scalar_select %p46_p7, %s2320_s20, %s48_s3  }
  0x48   : > { %p469_p0 = scmp.eq.s32.totalorder %s1522_s13, 1  ;;  %p1756_p2 = scmp.lt.s32.totalorder %s2324_s21, 2 }
  0x49   : > { %s655_s2 = sand.u32 1, %s2320_s20   ;;  %p2569_p5 = por %p463_p13, %p55_p8 }
  0x4a   : > { %p2573_p6 = por %p469_p0, %p61_p10  ;;  %s1537_s8 = sshll.u32 %s655_s2, 2 }
  0x4b   : > { %s1538_s6 = sshll.u32 %s2324_s21, 2  ;;  %s2796_s27 = sld [smem:[#allocation32_spill]] }
  0x4c   : > { %s659_s3 = scalar_lea.vmem [#allocation2], %s1537_s8  ;;  %p2583_p7 = pnand %p1756_p2, %p2556_p11 }
  0x4d   : > { %s667_s4 = sshll.u32 %s659_s3, 4  ;;  %s656_s9 = scalar_lea.sflag [#allocation3], %s655_s2  ;;  %s668_s4 = int_to_ptr.vmem [resolvable:$true] %s667_s4 }
  0x4e   : > { %p2208_p9 = pneg %p2583_p7 }
  0x51   : > { %s663_s29 = scalar_lea.hbm %s2796_s27, %s1538_s6  ;;  %s2211_s19 = scalar_lea.hbm %s2796_s27, 8 }
  0x52   : > { %s665_s7 = sshll.u32 %s663_s29, 4  ;;  %s666_s7 = int_to_ptr.hbm [resolvable:$true] %s665_s7 }
  0x53   : > { %s2204_s10 = sshra.s32 %s666_s7, 4  ;;  %s2205_s10 = int_to_ptr.hbm [resolvable:$true] %s2204_s10 }
  0x54   : > { %s2206_s11 = scalar_lea.hbm %s2205_s10, 4  ;;  %p2212_p11 = scmp.lt.s32.totalorder %s2205_s10, %s2796_s27 }
  0x55   : > { %p2207_p8 = scmp.ne.s32.totalorder %s2205_s10, %s2206_s11  ;;  %p2213_p0 = scmp.lt.s32.totalorder %s2211_s19, %s2206_s11 }
  0x57   : > { %p2209_p10 = pnand %p2208_p9, %p2207_p8  ;;  %p2214_p2 = por %p2213_p0, %p2212_p11 }
  0x59   : > { %p2210_p13 = pneg %p2209_p10 }
  0x5b   : > { %p2215_p4 = pnand %p2214_p2, %p2210_p13 }
  0x5d   : > { %2218 = shalt.err (!%p2215_p4)
}
  0x5e   : > { %1739 = dma.hbm_to_vmem [thread:$0]  (!%p2583_p7), %s666_s7, 64, %s668_s4, %s656_s9  }
  0x5f   : > { %676 = sbr.rel (%p2471_p3) target bundleno = 2280 (0x8e8), region = 96  ;;  %s2600_s2 = sand.u32 (!%p2471_p3), 1, %s2316_s30  }
  0x60   : > { %s1540_s29 = sshll.u32 (!%p2471_p3), %s2600_s2, 2  ;;  %s679_s3 = scalar_lea.sflag (!%p2471_p3), [#allocation3], %s2600_s2 }
  0x61   : > { %s682_s8 = scalar_lea.vmem (!%p2471_p3), [#allocation2], %s1540_s29 }
  0x64   : > { %2279 = dma.done.wait (%p2562_p12), %s679_s3, 64  }
  0x65   : > { %2281 = vsyncadd (%p2562_p12), %s679_s3, 4294967232 }
  0x66   : > { %2283 = dma.done.wait (%p62_p1), [#allocation6], 32  }
  0x67   : > { %2285 = vsyncadd (%p62_p1), [#allocation6], 4294967264 }
  0x68   : > { %2287 = dma.done.wait (%p62_p1), [#allocation9], 272  }
  0x69   : > { %2289 = vsyncadd (%p62_p1), [#allocation9], 4294967024 }
  0x6a   : > { %2291 = dma.done.wait (%p62_p1), [#allocation12], 32  }
  0x6b   : > { %2293 = vsyncadd (%p62_p1), [#allocation12], 4294967264 }
  0x6c   : > { %2295 = dma.done.wait (%p62_p1), [#allocation15], 272  }
  0x6d   : > { %2297 = vsyncadd (%p62_p1), [#allocation15], 4294967024 }
  0x6e   : > { %2299 = dma.done.wait (%p62_p1), [#allocation18], 32  }
  0x6f   : > { %2301 = vsyncadd (%p62_p1), [#allocation18], 4294967264 }
  0x70   : > { %2303 = dma.done.wait (%p62_p1), [#allocation21], 32  }
  0x71   : > { %2305 = vsyncadd (%p62_p1), [#allocation21], 4294967264  ;;  %s2798_s9 = sld [smem:[#allocation35_spill]]  ;;  %v2641_v3 = vld [vmem:[%s682_s8] sm:$0xf]  ;;  %vm819_vm0 = vcmask 261120  }
  0x72   : > { %s2799_s25 = sld [smem:[#allocation33_spill]]  ;;  %v877_v5 = vunpack.c.l.b16 %v2641_v3  ;;  %v1634_v8 = vld [vmem:[%s2746_s5 + $0x8] sm:$0xff]  ;;  %v1633_v9 = vld [vmem:[%s2746_s5] sm:$0xff]  ;;  %vm911_vm1 = vcmask 130048   ;;  %s2340_s8 = smov 112   ;;  %vm949_vm2 = vcmask 1043456  }
  0x73   : > { %863 = vmatpush.bf16.msra.mxu1 %v1634_v8  ;;  %v1818_v10 = vld [vmem:[#allocation7] ss:$0 sm:$0xff]  ;;  %v875_v14 = vld [vmem:[#allocation5] sm:$0x1]  ;;  %v1819_v25 = vld [vmem:[#allocation8] ss:$0 sm:$0xff] }
  0x74   : > { %v878_v6 = vpack.c.b16 %v877_v5, %v877_v5  ;;  %vm932_vm3 = vcmask 57344   ;;  %vm945_vm4 = vcmask 64512   ;;  %vm1091_vm5 = vcmask 254977   ;;  %s2800_s10 = sld [smem:[#allocation43_spill]]  ;;  %s796_s17 = scalar_lea.vmem [#allocation23], %s2600_s2 }
  0x75   : > { %vm1209_vm10 = vcmask 523264   ;;  %s2801_s3 = sld [smem:[#allocation44_spill]]  ;;  %vm1303_vm15 = vcmask 1040384   ;;  %s1340_s29 = sshll.u32 %s796_s17, 4  ;;  %s1341_s29 = int_to_ptr.vmem [resolvable:$true] %s1340_s29 }
  0x76   : > { %v880_v7 = vshrl.u32 %v878_v6, 16  ;;  %s2802_s1 = sld [smem:[#allocation45_spill]]  ;;  %s1330_s4 = scalar_lea.sflag [#allocation4], %s2600_s2 }
  0x77   : > { %v1632_v0 = vld [vmem:[%s2798_s9 + $0x8] sm:$0xff]  ;;  %v1631_v2 = vld [vmem:[%s2798_s9] sm:$0xff]  ;;  %864 = vmatpush.bf16.msra.mxu1 %v1633_v9  ;;  %s2803_s19 = sld [smem:[#allocation46_spill]] }
  0x78   : > { %v1636_v1 = vld [vmem:[%s2799_s25 + $0x8] sm:$0xff]  ;;  %829 = vmatpush.bf16.msra.mxu0 %v1632_v0  ;;  %v1635_v4 = vld [vmem:[%s2799_s25] sm:$0xff]  ;;  %v1638_v0 = vld [vmem:[#allocation10 + $0x8] sm:$0xff] }
  0x79   : > { %903 = vmatpush.bf16.msra.mxu2 %v1636_v1  ;;  %v1637_v1 = vld [vmem:[#allocation10] sm:$0xff] }
  0x7a   : > { %1570 = vmatmul.msk.bf16.vlgmr.msra.gmra.mxu1 %vm819_vm0, %v2641_v3 }
  0x7c   : > { %830 = vmatpush.bf16.msra.mxu0 %v1631_v2 }
  0x7d   : > { %904 = vmatpush.bf16.msra.mxu2 %v1635_v4  ;;  %s1338_s26 = scalar_lea.hbm %s2803_s19, %s2466_s24  ;;  %s2254_s13 = scalar_lea.hbm %s2803_s19, 2 }
  0x7f   : > { %1561 = vmatmul.msk.bf16.vlgmr.msra.gmra.mxu0 %vm819_vm0, %v2641_v3 }
  0x80   : > { %1579 = vmatmul.msk.bf16.vlgmr.msra.gmra.mxu2 %vm819_vm0, %v880_v7 }
  0xf7   : > { %v866_v26 = vpop.f32.mrf.mxu1 }
  0xf8   : > { %v867_v27 = vadd.f32 %v1819_v25, %v866_v26 }
  0xfa   : > { %v870_v30 = vpack.c.bf16 %v867_v27, %v867_v27 }
  0xfc   : > { %v832_v11 = vpop.f32.mrf.mxu0  ;;  %v951_v31 = vsel %vm949_vm2, %v870_v30, 0  ;;  %v1012_v52 = vunpack.c.l.b16 %v870_v30 }
  0xfd   : > { %v833_v12 = vadd.f32 %v1818_v10, %v832_v11  ;;  %960 = vmatpush.bf16.msrb.mxu0 %v951_v31  ;;  %v1082_v11 = vld [vmem:[#allocation11] sm:$0x1]  ;;  %v1640_v31 = vld [vmem:[#allocation16 + $0x8] sm:$0xff] }
  0xfe   : > { %v1013_v53 = vpack.c.b16 %v1012_v52, %v1012_v52  ;;  %v1642_v52 = vld [vmem:[%s2800_s10 + $0x8] sm:$0xff] }
  0xff   : > { %v836_v13 = vpack.c.bf16 %v833_v12, %v833_v12  ;;  %v868_v32 = vpop.f32.mrf.mxu1 }
 0x100   : > { %v1639_v32 = vld [vmem:[#allocation16] sm:$0xff] }
 0x101   : > { %v916_v15 = vsel %vm911_vm1, %v836_v13, 0  ;;  %v975_v16 = vunpack.c.l.b16 %v836_v13  ;;  %1076 = vmatpush.bf16.msra.mxu0 %v1637_v1 }
 0x102   : > { %925 = vmatpush.bf16.xpose.msra.mxu3 %v916_v15  ;;  %v1084_v15 = vunpack.c.l.bf16 %v2641_v3 }
 0x103   : > { %v906_v17 = vpop.f32.mrf.mxu2  ;;  %v976_v19 = vpack.c.b16 %v975_v16, %v975_v16 }
 0x104   : > { %v907_v18 = vadd.f32 %v906_v17, %v875_v14  ;;  %v834_v20 = vpop.f32.mrf.mxu0 }
 0x105   : > { %977 = vrot.lane.b32.xlu0 %v976_v19, %s2340_s8  ;;  %v2341_v20 = vmov 32.0  }
 0x106   : > { %v910_v21 = vpack.c.bf16 %v907_v18, %v907_v18 }
 0x108   : > { %v970_v22 = vunpack.c.l.b16 %v910_v21 }
 0x109   : > { %1580 = vmatmul.msk.bf16.vlgmr.msra.gmra.mxu3 %vm911_vm1, %v910_v21 }
 0x10a   : > { %v971_v23 = vpack.c.b16 %v970_v22, %v970_v22  ;;  %1054 = vmatpush.bf16.msrb.mxu3 %v1638_v0 }
 0x10b   : > { %v908_v24 = vpop.f32.mrf.mxu2 }
 0x10d   : > { %972 = vrot.lane.b32.xlu0 %v971_v23, %s2340_s8 }
 0x177   : > { %v978_v28 = vpop.permute.xlu0 %977 }
 0x178   : > { %v983_v29 = vsel %vm911_vm1, %v978_v28, 0 }
 0x179   : > { %992 = vmatpush.bf16.xpose.msrb.mxu1 %v983_v29 }
 0x17f   : > { %v973_v33 = vpop.permute.xlu0 %972 }
 0x180   : > { %1582 = vmatmul.msk.bf16.vlgmr.msrb.gmra.mxu1 %vm911_vm1, %v973_v33 }
 0x181   : > { %1159 = vmatpush.bf16.msra.mxu1 %v1640_v31  ;;  %v1823_v31 = vld [vmem:[#allocation22] ss:$0 sm:$0xff] }
 0x185   : > { %1160 = vmatpush.bf16.msra.mxu1 %v1639_v32 }
 0x18c   : > { %v927_v34 = vpop.f32.mrf.mxu3 }
 0x18d   : > { %v931_v39 = vmul.f32 0.25, %v927_v34 }
 0x18f   : > { %v933_v41 = vsel %vm932_vm3, %v931_v39, -inf }
 0x194   : > { %v929_v35 = vpop.f32.mrf.mxu3 }
 0x1fd   : > { %v994_v36 = vpop.f32.mrf.mxu1 }
 0x1fe   : > { %v998_v37 = vmul.f32 0.25, %v994_v36 }
 0x200   : > { %v999_v38 = vsel %vm932_vm3, %v998_v37, -inf }
 0x201   : > { %1000 = vmax.xlane.f32.xlu1 %v999_v38 }
 0x205   : > { %v996_v40 = vpop.f32.mrf.mxu1 }
 0x209   : > { %934 = vmax.xlane.f32.xlu1 %v933_v41 }
 0x274   : > { %v1001_v42 = vpop.xlane.xlu1 %1000 }
 0x275   : > { %v1002_v43 = vsub.f32 %v998_v37, %v1001_v42  ;;  %v1820_v42 = vld [vmem:[#allocation13] ss:$0 sm:$0xff] }
 0x277   : > { %v1003_v44 = vmul.f32 1.442695, %v1002_v43 }
 0x279   : > { %1824 = vpow2.f32 %v1003_v44  ;;  %v1821_v44 = vld [vmem:[#allocation14] ss:$0 sm:$0xff] }
 0x27c   : > { %v935_v45 = vpop.xlane.xlu1 %934 }
 0x27d   : > { %v936_v46 = vsub.f32 %v931_v39, %v935_v45 }
 0x27f   : > { %v1825_v47 = vpop.eup %1824  ;;  %v937_v48 = vmul.f32 1.442695, %v936_v46 }
 0x280   : > { %v1005_v49 = vsel %vm932_vm3, %v1825_v47, 0.0 }
 0x281   : > { %1826 = vpow2.f32 %v937_v48  ;;  %1006 = vadd.xlane.f32.xlu2 %v1005_v49 }
 0x287   : > { %v1827_v50 = vpop.eup %1826 }
 0x288   : > { %v939_v51 = vsel %vm932_vm3, %v1827_v50, 0.0 }
 0x289   : > { %940 = vadd.xlane.f32.xlu0 %v939_v51  ;;  %v1643_v51 = vld [vmem:[%s2800_s10 + $0x10] sm:$0xff] }
 0x299   : > { %1014 = vrot.lane.b32.xlu2 %v1013_v53, %s2340_s8  ;;  %v1641_v53 = vld [vmem:[%s2800_s10] sm:$0xff]  ;;  %s1342_s8 = sshll.u32 %s1338_s26, 4  ;;  %s1343_s8 = int_to_ptr.hbm [resolvable:$true] %s1342_s8 }
 0x29a   : > { %s2248_s7 = sshra.s32 %s1343_s8, 4  ;;  %s2249_s7 = int_to_ptr.hbm [resolvable:$true] %s2248_s7 }
 0x29b   : > { %s2250_s11 = scalar_lea.hbm %s2249_s7, 1  ;;  %p2255_p12 = scmp.lt.s32.totalorder %s2249_s7, %s2803_s19 }
 0x29c   : > { %p2251_p1 = scmp.ne.s32.totalorder %s2249_s7, %s2250_s11  ;;  %p2256_p7 = scmp.lt.s32.totalorder %s2254_s13, %s2250_s11 }
 0x29e   : > { %p2252_p3 = pnand %p2251_p1, %p2569_p5  ;;  %p2257_p8 = por %p2256_p7, %p2255_p12 }
 0x2a0   : > { %p2253_p4 = pneg %p2252_p3 }
 0x2a2   : > { %p2258_p9 = pnand %p2257_p8, %p2253_p4 }
 0x2f4   : > { %v1007_v54 = vpop.xlane.xlu2 %1006 }
 0x2f5   : > { %1828 = vrcp.f32 %v1007_v54  ;;  %v1134_v54 = vld [vmem:[#allocation17] sm:$0x1] }
 0x2fb   : > { %v1829_v55 = vpop.eup %1828 }
 0x2fc   : > { %v1009_v56 = vmul.f32 %v1829_v55, %v1825_v47  ;;  %v1015_v57 = vpop.permute.xlu2 %1014  ;;  %v941_v58 = vpop.xlane.xlu0 %940 }
 0x2fd   : > { %1830 = vrcp.f32 %v941_v58  ;;  %v1020_v59 = vsel %vm949_vm2, %v1015_v57, 0 }
 0x2fe   : > { %1029 = vmatpush.bf16.msrb.mxu2 %v1020_v59  ;;  %v1010_v60 = vpack.c.bf16 %v1009_v56, %v1009_v56  ;;  %1832 = vrcp.f32 %v2341_v20 }
 0x301   : > { %1583 = vmatmul.msk.bf16.vlgmr.msrb.gmra.mxu2 %vm945_vm4, %v1010_v60 }
 0x303   : > { %v1831_v61 = vpop.eup %1830 }
 0x304   : > { %v943_v62 = vmul.f32 %v1831_v61, %v1827_v50  ;;  %v1833_v21 = vpop.eup %1832  ;;  %v1644_v50 = vld [vmem:[%s2800_s10 + $0x18] sm:$0xff] }
 0x305   : > { %v1096_v22 = vmul.f32 32.0, %v1833_v21  ;;  %vm1100_vm6 = vweird.f32 %v1833_v21  ;;  %1217 = vmatpush.bf16.msra.mxu2 %v1644_v50 }
 0x306   : > { %v944_v63 = vpack.c.bf16 %v943_v62, %v943_v62 }
 0x307   : > { %v1097_v23 = vsub.f32 1.0, %v1096_v22 }
 0x308   : > { %1581 = vmatmul.msk.bf16.vlgmr.msrb.gmra.mxu0 %vm945_vm4, %v944_v63 }
 0x309   : > { %v1098_v24 = vmul.f32 %v1833_v21, %v1097_v23  ;;  %1218 = vmatpush.bf16.msra.mxu2 %v1643_v51 }
 0x30b   : > { %v1099_v25 = vadd.f32 %v1833_v21, %v1098_v24 }
 0x30d   : > { %v2675_v26 = vsel %vm1100_vm6, %v1833_v21, %v1099_v25  ;;  %1219 = vmatpush.bf16.msra.mxu2 %v1642_v52 }
 0x311   : > { %1220 = vmatpush.bf16.msra.mxu2 %v1641_v53 }
 0x384   : > { %v1031_v2 = vpop.f32.mrf.mxu2 }
 0x385   : > { %v1035_v4 = vpack.c.bf16 %v1031_v2, %v1031_v2  ;;  %v962_v5 = vpop.f32.mrf.mxu0 }
 0x386   : > { %v966_v6 = vpack.c.bf16 %v962_v5, %v962_v5  ;;  %v1184_v5 = vld [vmem:[#allocation19] sm:$0x1] }
 0x387   : > { %1588 = vmatmul.msk.bf16.vlgmr.msrb.gmra.mxu3 %vm911_vm1, %v1035_v4 }
 0x388   : > { %1593 = vmatmul.msk.bf16.vlgmr.msra.gmra.mxu0 %vm911_vm1, %v966_v6 }
 0x38c   : > { %v1033_v7 = vpop.f32.mrf.mxu2 }
 0x38d   : > { %v964_v8 = vpop.f32.mrf.mxu0 }
 0x405   : > { %v1078_v9 = vpop.f32.mrf.mxu0 }
 0x40a   : > { %v1056_v10 = vpop.f32.mrf.mxu3 }
 0x40b   : > { %v1079_v12 = vadd.f32 %v1078_v9, %v1056_v10 }
 0x40d   : > { %v1083_v13 = vadd.f32 %v1082_v11, %v1079_v12  ;;  %v1080_v14 = vpop.f32.mrf.mxu0 }
 0x40f   : > { %v1086_v16 = vrot.slane %v1083_v13, 7 }
 0x411   : > { %v1088_v17 = vadd.f32 %v1086_v16, %v1084_v15 }
 0x412   : > { %v1058_v18 = vpop.f32.mrf.mxu3 }
 0x413   : > { %v1092_v19 = vsel %vm1091_vm5, %v1088_v17, 0.0  ;;  %v1645_v18 = vld [vmem:[%s2801_s3] sm:$0xff] }
 0x414   : > { %1093 = vadd.xlane.f32.xlu1 %v1092_v19 }
 0x487   : > { %v1094_v27 = vpop.xlane.xlu1 %1093 }
 0x488   : > { %v1102_v3 = vmul.f32 %v2675_v26, %v1094_v27 }
 0x48a   : > { %v1103_v28 = vsub.f32 %v1088_v17, %v1102_v3  ;;  %v1646_v17 = vld [vmem:[%s2801_s3 + $0x8] sm:$0xff] }
 0x48b   : > { %1292 = vmatpush.bf16.msra.mxu3 %v1646_v17 }
 0x48c   : > { %v1104_v29 = vmul.f32 %v1103_v28, %v1103_v28 }
 0x48e   : > { %v1105_v30 = vsel %vm1091_vm5, %v1104_v29, 0.0 }
 0x48f   : > { %1106 = vadd.xlane.f32.xlu1 %v1105_v30  ;;  %1293 = vmatpush.bf16.msra.mxu3 %v1645_v18 }
 0x502   : > { %v1107_v33 = vpop.xlane.xlu1 %1106 }
 0x503   : > { %v1108_v34 = vmul.f32 %v1107_v33, %v2675_v26 }
 0x505   : > { %v1109_v35 = vadd.f32 1e-12, %v1108_v34 }
 0x507   : > { %1834 = vrsqrt.f32 %v1109_v35  ;;  %vm1116_vm8 = vweird.f32 %v1109_v35 }
 0x50d   : > { %v1835_v36 = vpop.eup %1834 }
 0x50e   : > { %v1111_v37 = vmul.f32 %v1835_v36, %v1109_v35  ;;  %vm1117_vm7 = vweird.f32 %v1835_v36 }
 0x50f   : > { %vm1118_vm9 = vmor %vm1116_vm8, %vm1117_vm7 }
 0x510   : > { %v1112_v38 = vmul.f32 %v1835_v36, %v1111_v37  ;;  %v1267_v37 = vld [vmem:[%s2802_s1] sm:$0x1] }
 0x512   : > { %v1113_v39 = vmul.f32 0.5, %v1112_v38 }
 0x514   : > { %v1114_v40 = vsub.f32 1.5, %v1113_v39 }
 0x516   : > { %v1115_v41 = vmul.f32 %v1835_v36, %v1114_v40 }
 0x518   : > { %v1119_v43 = vsel %vm1118_vm9, %v1835_v36, %v1115_v41 }
 0x519   : > { %v1120_v45 = vmul.f32 %v1119_v43, %v1103_v28  ;;  %v1822_v28 = vld [vmem:[#allocation20] ss:$0 sm:$0xff] }
 0x51b   : > { %v1124_v46 = vmul.f32 %v1820_v42, %v1120_v45 }
 0x51d   : > { %v1128_v47 = vadd.f32 %v1821_v44, %v1124_v46 }
 0x51f   : > { %v1129_v48 = vpack.c.bf16 %v1128_v47, %v1128_v47 }
 0x521   : > { %v1136_v49 = vshrl.u32 %v1129_v48, 16 }
 0x523   : > { %1602 = vmatmul.msk.bf16.vlgmr.msra.gmra.mxu1 %vm819_vm0, %v1136_v49 }
 0x5a0   : > { %v1162_v55 = vpop.f32.mrf.mxu1 }
 0x5a1   : > { %v1163_v56 = vadd.f32 %v1162_v55, %v1134_v54 }
 0x5a3   : > { %v1166_v57 = vmul.f32 %v1163_v56, %v1163_v56 }
 0x5a5   : > { %v1167_v58 = vmul.f32 %v1166_v57, %v1163_v56 }
 0x5a7   : > { %v1168_v59 = vmul.f32 0.044715, %v1167_v58 }
 0x5a8   : > { %v1164_v60 = vpop.f32.mrf.mxu1 }
 0x5a9   : > { %v1169_v61 = vadd.f32 %v1168_v59, %v1163_v56 }
 0x5ab   : > { %v1170_v62 = vmul.f32 0.7978846, %v1169_v61 }
 0x5ad   : > { %1836 = vtanh.f32 %v1170_v62 }
 0x5b3   : > { %v1837_v63 = vpop.eup %1836 }
 0x5b4   : > { %v1172_v0 = vadd.f32 1.0, %v1837_v63 }
 0x5b6   : > { %v1173_v1 = vmul.f32 0.5, %v1172_v0 }
 0x5b8   : > { %v1174_v2 = vmul.f32 %v1173_v1, %v1163_v56 }
 0x5ba   : > { %v1175_v4 = vpack.c.bf16 %v1174_v2, %v1174_v2 }
 0x5bc   : > { %1619 = vmatmul.msk.bf16.vlgmr.msra.gmra.mxu2 %vm1209_vm10, %v1175_v4 }
 0x63f   : > { %v1222_v6 = vpop.f32.mrf.mxu2 }
 0x640   : > { %v1223_v7 = vadd.f32 %v1222_v6, %v1184_v5 }
 0x642   : > { %v1227_v8 = vrot.slane %v1223_v7, 7 }
 0x644   : > { %v1229_v9 = vadd.f32 %v1227_v8, %v1128_v47 }
 0x646   : > { %v1232_v10 = vsel %vm1091_vm5, %v1229_v9, 0.0 }
 0x647   : > { %v1224_v11 = vpop.f32.mrf.mxu2  ;;  %1233 = vadd.xlane.f32.xlu1 %v1232_v10 }
 0x6ba   : > { %v1234_v12 = vpop.xlane.xlu1 %1233 }
 0x6bb   : > { %v1235_v13 = vmul.f32 %v1234_v12, %v2675_v26 }
 0x6bd   : > { %v1236_v14 = vsub.f32 %v1229_v9, %v1235_v13 }
 0x6bf   : > { %v1237_v15 = vmul.f32 %v1236_v14, %v1236_v14 }
 0x6c1   : > { %v1238_v16 = vsel %vm1091_vm5, %v1237_v15, 0.0 }
 0x6c2   : > { %1239 = vadd.xlane.f32.xlu2 %v1238_v16 }
 0x735   : > { %v1240_v19 = vpop.xlane.xlu2 %1239 }
 0x736   : > { %v1241_v20 = vmul.f32 %v1240_v19, %v2675_v26  ;;  %v1299_v26 = vlaneseq }
 0x738   : > { %v1242_v21 = vadd.f32 1e-12, %v1241_v20  ;;  %v1300_v36 = vand.u32 127, %v1299_v26 }
 0x73a   : > { %1838 = vrsqrt.f32 %v1242_v21  ;;  %vm1249_vm12 = vweird.f32 %v1242_v21  ;;  %vm1301_vm14 = vcmp.lt.s32.totalorder %v1300_v36, 5 }
 0x740   : > { %v1839_v22 = vpop.eup %1838 }
 0x741   : > { %v1244_v23 = vmul.f32 %v1839_v22, %v1242_v21  ;;  %vm1250_vm11 = vweird.f32 %v1839_v22 }
 0x742   : > { %vm1251_vm13 = vmor %vm1249_vm12, %vm1250_vm11 }
 0x743   : > { %v1245_v24 = vmul.f32 %v1839_v22, %v1244_v23 }
 0x745   : > { %v1246_v25 = vmul.f32 0.5, %v1245_v24 }
 0x747   : > { %v1247_v27 = vsub.f32 1.5, %v1246_v25 }
 0x749   : > { %v1248_v3 = vmul.f32 %v1839_v22, %v1247_v27 }
 0x74b   : > { %v1252_v29 = vsel %vm1251_vm13, %v1839_v22, %v1248_v3 }
 0x74c   : > { %v1253_v30 = vmul.f32 %v1252_v29, %v1236_v14 }
 0x74e   : > { %v1257_v32 = vmul.f32 %v1822_v28, %v1253_v30 }
 0x750   : > { %v1261_v33 = vadd.f32 %v1823_v31, %v1257_v32 }
 0x752   : > { %v1262_v34 = vpack.c.bf16 %v1261_v33, %v1261_v33 }
 0x754   : > { %v1269_v35 = vshrl.u32 %v1262_v34, 16 }
 0x756   : > { %1628 = vmatmul.msk.bf16.vlgmr.msra.gmra.mxu3 %vm819_vm0, %v1269_v35 }
 0x7d9   : > { %v1295_v38 = vpop.f32.mrf.mxu3 }
 0x7da   : > { %v1296_v39 = vadd.f32 %v1295_v38, %v1267_v37 }
 0x7dc   : > { %v1302_v40 = vsel %vm1301_vm14, %v1296_v39, -1e+30 }
 0x7dd   : > { %v1304_v41 = vsel %vm1303_vm15, %v1302_v40, -inf }
 0x7de   : > { %1305 = vmax.xlane.f32.xlu1 %v1304_v41 }
 0x7e1   : > { %v1297_v42 = vpop.f32.mrf.mxu3 }
 0x851   : > { %v1306_v43 = vpop.xlane.xlu1 %1305 }
 0x852   : > { %v1307_v44 = vsub.f32 %v1302_v40, %v1306_v43 }
 0x854   : > { %v1308_v45 = vmul.f32 1.442695, %v1307_v44 }
 0x856   : > { %1840 = vpow2.f32 %v1308_v45 }
 0x85c   : > { %v1841_v46 = vpop.eup %1840 }
 0x85d   : > { %v1310_v47 = vsel %vm1303_vm15, %v1841_v46, 0.0 }
 0x85e   : > { %1311 = vadd.xlane.f32.xlu1 %v1310_v47 }
 0x8d1   : > { %v1312_v48 = vpop.xlane.xlu1 %1311 }
 0x8d2   : > { %1842 = vrcp.f32 %v1312_v48  ;;  %v1324_v52 = vand.u32 2147483648, %v1312_v48  ;;  %v1322_v54 = vand.u32 2147483647, %v1312_v48  ;;  %vm1318_vm1 = vweird.f32 %v1312_v48 }
 0x8d4   : > { %v1325_v56 = vor.u32 1.1754944e-38, %v1324_v52  ;;  %vm1323_vm3 = vcmp.eq.f32.partialorder %v1322_v54, 8.507059e+37 }
 0x8d8   : > { %v1843_v49 = vpop.eup %1842 }
 0x8d9   : > { %v1314_v50 = vmul.f32 %v1843_v49, %v1312_v48  ;;  %vm1319_vm0 = vweird.f32 %v1843_v49 }
 0x8da   : > { %vm1320_vm2 = vmor %vm1318_vm1, %vm1319_vm0 }
 0x8db   : > { %v1315_v51 = vsub.f32 1.0, %v1314_v50 }
 0x8dd   : > { %v1316_v53 = vmul.f32 %v1843_v49, %v1315_v51 }
 0x8df   : > { %v1317_v55 = vadd.f32 %v1843_v49, %v1316_v53 }
 0x8e1   : > { %v1321_v57 = vsel %vm1320_vm2, %v1843_v49, %v1317_v55 }
 0x8e2   : > { %v1326_v58 = vsel %vm1323_vm3, %v1325_v56, %v1321_v57 }
 0x8e3   : > { %v1327_v59 = vmul.f32 %v1841_v46, %v1326_v58 }
 0x8e5   : > { %1328 = vst [vmem:[%s796_s17] sm:$0x1] %v1327_v59 }
 0x8e6   : > { %2261 = shalt.err (!%p2258_p9)
}
 0x8e7   : > { %1697 = dma.vmem_to_hbm [thread:$0]  (%p2569_p5), %s1341_s29, 16, %s1343_s8, %s1330_s4  }
 0x8e8 PF: > { %s1354_s2 = sand.u32 1, %s2312_s0   ;;  %p2804_p10 = scmp.ge.s32.totalorder %s2324_s21, 2 }
 0x8e9   : > { %s1355_s17 = scalar_lea.sflag [#allocation4], %s1354_s2 }
 0x8ea   : > { %p1741_p13 = pnand %p2804_p10, %p2573_p6 }
 0x8ec   : > { %p1742_p11 = pneg %p1741_p13 }
 0x8ee   : > { %2307 = dma.done.wait (%p1742_p11), %s1355_s17, 16  }
 0x8ef   : > { %2309 = vsyncadd (%p1742_p11), %s1355_s17, 4294967280  ;;  %p38_p0 = scmp.ge.s32.totalorder %s2543_s22, 4   ;;  %s2805_s0 = smov %s2316_s30 }
 0x8f0   : > { %s2806_s30 = smov %s2320_s20  ;;  %s2807_s20 = smov %s2554_s23 }
 0x8f1   : > { %s2808_s21 = smov %s2543_s22  ;;  %40 = sbr.rel (!%p38_p0) target bundleno = 27 (0x1b), region = 189 }
 0x8f6   :  { %1360 = vsyncpa [#allocation3], 1 }
 0x8f7   :  { %1362 = vsyncpa [#allocation3 + $0x1], 1 }
 0x8f8   :  { %1363 = vsyncpa [#allocation6], 1 }
 0x8f9   :  { %1364 = vsyncpa [#allocation9], 1 }
 0x8fa   :  { %1365 = vsyncpa [#allocation12], 1 }
 0x8fb   :  { %1366 = vsyncpa [#allocation15], 1 }
 0x8fc   :  { %1367 = vsyncpa [#allocation18], 1 }
 0x8fd   :  { %1368 = vsyncpa [#allocation21], 1 }
 0x8fe   :  { %1369 = vsyncpa [#allocation4], 1 }
 0x8ff   :  { %1371 = vsyncpa [#allocation4 + $0x1], 1 }

</bundles_post_ra>
